<compile_context>
chip_gen: v7x
topology: tpu7x:2x2x1
jax: 0.10.0
libtpu: 0.0.40
codegen_flags: <defaults>
</compile_context>

<pallas_src>
import jax
import jax.numpy as jnp
from jax.experimental import pallas as pl
from jax.experimental.pallas import tpu as pltpu

# ---- problem sizes (consistent with the module's forward) --------------------
B, C, H, W = 2, 4, 16, 16              # image: (bs, channels, height, width)
NUM_MODES, FUTURE_LEN, NUM_COORDS = 3, 8, 2
IN_DIM = C * H * W                     # 1024
TC = FUTURE_LEN * NUM_COORDS           # 16  (time * coords, flattened row-major)
PRED_DIM = NUM_MODES * TC              # 48
OUT_DIM = PRED_DIM + NUM_MODES         # 51


# ---- fused Pallas kernel -----------------------------------------------------
def _fused_kernel(x_ref, w_ref, b_ref, gt_ref, av_ref, loss_ref):
    """Linear predictor + log-softmax confidences + multi-modal NLL, fused.

    x:  (B, IN_DIM)  bf16      w: (IN_DIM, OUT_DIM) bf16   b: (1, OUT_DIM) f32
    gt: (B, T*C)     f32       av: (B, T*C)         f32    (avails repeated per coord)
    loss_out: (1, 1) f32  -- mean over batch of the negative log-likelihood.
    """
    # Predictor head: MXU matmul with bf16 inputs, f32 accumulation.
    y = jnp.dot(x_ref[...], w_ref[...], preferred_element_type=jnp.float32)
    y = y + b_ref[...]                                   # (B, OUT_DIM) f32

    # Mode confidences as a log-softmax (numerically safe log term).
    logits = y[:, PRED_DIM:]                             # (B, M)
    mx_l = jnp.max(logits, axis=-1, keepdims=True)
    lse_l = jnp.log(jnp.sum(jnp.exp(logits - mx_l), axis=-1, keepdims=True)) + mx_l
    log_conf = logits - lse_l                            # (B, M) == log(softmax)

    gt = gt_ref[...]                                     # (B, T*C)
    av = av_ref[...]                                     # (B, T*C)

    # Per-mode squared error (mode broadcast done here, in VMEM, not in HBM).
    per_mode_score = []
    for k in range(NUM_MODES):
        pred_k = y[:, k * TC:(k + 1) * TC]               # (B, T*C)
        d = (gt - pred_k) * av
        err_k = jnp.sum(d * d, axis=-1, keepdims=True)   # (B, 1)
        per_mode_score.append(log_conf[:, k:k + 1] - 0.5 * err_k)

    # log-sum-exp over modes (unrolled, NUM_MODES=3 -> pure VPU/EUP).
    mx = per_mode_score[0]
    for s in per_mode_score[1:]:
        mx = jnp.maximum(mx, s)
    sexp = jnp.zeros_like(mx)
    for s in per_mode_score:
        sexp = sexp + jnp.exp(s - mx)
    per_sample = -(jnp.log(sexp) + mx)                   # (B, 1)

    loss_ref[...] = jnp.mean(per_sample, axis=0, keepdims=True)   # (1, 1)


_COST = pl.CostEstimate(
    flops=2 * B * IN_DIM * OUT_DIM + 16 * B * NUM_MODES * TC,
    transcendentals=2 * B * (NUM_MODES + 1),
    bytes_accessed=(B * IN_DIM * 2) + (IN_DIM * OUT_DIM * 2) + (OUT_DIM * 4)
                   + 2 * (B * TC * 4) + 4,
)

_VMEM_SPEC = pl.BlockSpec(memory_space=pltpu.MemorySpace.VMEM)

_fused_call = pl.pallas_call(
    _fused_kernel,
    out_shape=jax.ShapeDtypeStruct((1, 1), jnp.float32),
    in_specs=[_VMEM_SPEC] * 5,
    out_specs=_VMEM_SPEC,
    cost_estimate=_COST,
)


# ---- wrapper (glue: reshapes / dtype policy only) ----------------------------
def multi_regressor_forward(image, targets, target_availabilities, w, b):
    """Forward pass of MultiRegressor: (loss, metrics)."""
    x = image.reshape(B, IN_DIM).astype(jnp.bfloat16)          # bf16 MXU input
    w_bf16 = w.astype(jnp.bfloat16)                            # halves weight HBM read
    gt = targets.reshape(B, TC).astype(jnp.float32)
    av = jnp.repeat(target_availabilities.astype(jnp.float32), NUM_COORDS, axis=-1)

    loss = _fused_call(x, w_bf16, b.astype(jnp.float32), gt, av)[0, 0]

    # Compute the NLL once and reuse it: lossfun(args) == nll(args) identically.
    # TODO(synk): ppe.reporting.report(...) and Tensor.item() are host-side
    # side effects with no Pallas equivalent; metrics are returned as JAX scalars.
    metrics = {"loss": loss, "nll": loss}
    return loss, metrics


# ---- pure-JAX reference (for verification) -----------------------------------
def _ref_loss(gt, pred, confidences, avails):
    gt_u = gt[:, None]
    av = avails[:, None, :, None]
    error = jnp.sum(((gt_u - pred) * av) ** 2, axis=-1)
    error = jnp.log(confidences) - 0.5 * jnp.sum(error, axis=-1)
    mx = jnp.max(error, axis=1, keepdims=True)
    error = -jnp.log(jnp.sum(jnp.exp(error - mx), axis=-1, keepdims=True)) - mx
    return jnp.mean(error)


def _ref_forward(image, targets, avails, w, b, cast_bf16):
    xf = image.reshape(B, IN_DIM)
    wf = w
    if cast_bf16:  # same mixed-precision policy as the kernel (bf16 in, f32 accum)
        xf = xf.astype(jnp.bfloat16).astype(jnp.float32)
        wf = wf.astype(jnp.bfloat16).astype(jnp.float32)
    y = xf @ wf + b
    pred = y[:, :PRED_DIM].reshape(B, NUM_MODES, FUTURE_LEN, NUM_COORDS)
    conf = jax.nn.softmax(y[:, PRED_DIM:], axis=-1)
    return _ref_loss(targets, pred, conf, avails)


if __name__ == "__main__":
    key = jax.random.PRNGKey(0)
    k_img, k_tgt, k_av, k_w, k_b = jax.random.split(key, 5)

    image = jax.random.normal(k_img, (B, C, H, W), dtype=jnp.float32)
    targets = jax.random.normal(k_tgt, (B, FUTURE_LEN, NUM_COORDS), dtype=jnp.float32)
    target_availabilities = (
        jax.random.uniform(k_av, (B, FUTURE_LEN)) > 0.2
    ).astype(jnp.float32)

    # deterministic synthetic predictor parameters
    w_param = 0.02 * jax.random.normal(k_w, (IN_DIM, OUT_DIM), dtype=jnp.float32)
    b_param = 0.01 * jax.random.normal(k_b, (1, OUT_DIM), dtype=jnp.float32)

    loss, metrics = jax.jit(multi_regressor_forward)(
        image, targets, target_availabilities, w_param, b_param
    )
    jax.block_until_ready(loss)

    # reference with the kernel's precision policy (bf16 MXU inputs) -> tight check
    loss_ref_bf16 = _ref_forward(image, targets, target_availabilities,
                                 w_param, b_param, cast_bf16=True)
    assert jnp.allclose(loss, loss_ref_bf16, rtol=1e-4, atol=1e-4), (loss, loss_ref_bf16)

    # full-f32 reference -> loose sanity check on the bf16 matmul policy
    loss_ref_f32 = _ref_forward(image, targets, target_availabilities,
                                w_param, b_param, cast_bf16=False)
    assert jnp.allclose(loss, loss_ref_f32, rtol=1e-2, atol=1e-2), (loss, loss_ref_f32)

    assert jnp.allclose(metrics["nll"], loss)

    print("KERNEL_OK")
</pallas_src>

<mosaic_0001>
module attributes {stable_mosaic.version = 11 : i64} {
  func.func @_fused_kernel(%arg0: memref<2x1024xbf16, #tpu.memory_space<vmem>>, %arg1: memref<1024x51xbf16, #tpu.memory_space<vmem>>, %arg2: memref<1x51xf32, #tpu.memory_space<vmem>>, %arg3: memref<2x16xf32, #tpu.memory_space<vmem>>, %arg4: memref<2x16xf32, #tpu.memory_space<vmem>>, %arg5: memref<1x1xf32, #tpu.memory_space<vmem>>) attributes {dimension_semantics = [], scalar_prefetch = 0 : i64, scratch_operands = 0 : i64, tpu.core_type = #tpu.core_type<tc>} {
    %c0 = arith.constant 0 : index
    %c0_0 = arith.constant 0 : index
    %0 = vector.load %arg0[%c0, %c0_0] : memref<2x1024xbf16, #tpu.memory_space<vmem>>, vector<2x1024xbf16>
    %c0_1 = arith.constant 0 : index
    %c0_2 = arith.constant 0 : index
    %1 = vector.load %arg1[%c0_1, %c0_2] : memref<1024x51xbf16, #tpu.memory_space<vmem>>, vector<1024x51xbf16>
    %cst = arith.constant dense<0.000000e+00> : vector<2x51xf32>
    %2 = tpu.matmul %0, %1, %cst {dimension_numbers = #tpu.dot_dimension_numbers<[1], [0], [0], [1], [0, 0, 1, 1], [], []>} : vector<2x1024xbf16>, vector<1024x51xbf16>, vector<2x51xf32> -> vector<2x51xf32>
    %c0_3 = arith.constant 0 : index
    %c0_4 = arith.constant 0 : index
    %3 = vector.load %arg2[%c0_3, %c0_4] : memref<1x51xf32, #tpu.memory_space<vmem>>, vector<1x51xf32>
    %4 = vector.broadcast %3 : vector<1x51xf32> to vector<2x51xf32>
    %5 = arith.addf %2, %4 : vector<2x51xf32>
    %6 = vector.extract_strided_slice %5 {offsets = [0, 48], sizes = [2, 3], strides = [1, 1]} : vector<2x51xf32> to vector<2x3xf32>
    %cst_5 = arith.constant dense<0xFF800000> : vector<2xf32>
    %7 = vector.multi_reduction <maximumf>, %6, %cst_5 [1] : vector<2x3xf32> to vector<2xf32>
    %8 = vector.shape_cast %7 : vector<2xf32> to vector<2x1xf32>
    %9 = vector.broadcast %8 : vector<2x1xf32> to vector<2x3xf32>
    %10 = arith.subf %6, %9 : vector<2x3xf32>
    %11 = math.exp %10 : vector<2x3xf32>
    %cst_6 = arith.constant dense<0.000000e+00> : vector<2xf32>
    %12 = vector.multi_reduction <add>, %11, %cst_6 [1] : vector<2x3xf32> to vector<2xf32>
    %13 = vector.shape_cast %12 : vector<2xf32> to vector<2x1xf32>
    %14 = math.log %13 : vector<2x1xf32>
    %15 = arith.addf %14, %8 : vector<2x1xf32>
    %16 = vector.broadcast %15 : vector<2x1xf32> to vector<2x3xf32>
    %17 = arith.subf %6, %16 : vector<2x3xf32>
    %c0_7 = arith.constant 0 : index
    %c0_8 = arith.constant 0 : index
    %18 = vector.load %arg3[%c0_7, %c0_8] : memref<2x16xf32, #tpu.memory_space<vmem>>, vector<2x16xf32>
    %c0_9 = arith.constant 0 : index
    %c0_10 = arith.constant 0 : index
    %19 = vector.load %arg4[%c0_9, %c0_10] : memref<2x16xf32, #tpu.memory_space<vmem>>, vector<2x16xf32>
    %20 = vector.extract_strided_slice %5 {offsets = [0, 0], sizes = [2, 16], strides = [1, 1]} : vector<2x51xf32> to vector<2x16xf32>
    %21 = arith.subf %18, %20 : vector<2x16xf32>
    %22 = arith.mulf %21, %19 : vector<2x16xf32>
    %23 = arith.mulf %22, %22 : vector<2x16xf32>
    %cst_11 = arith.constant dense<0.000000e+00> : vector<2xf32>
    %24 = vector.multi_reduction <add>, %23, %cst_11 [1] : vector<2x16xf32> to vector<2xf32>
    %25 = vector.shape_cast %24 : vector<2xf32> to vector<2x1xf32>
    %26 = vector.extract_strided_slice %17 {offsets = [0, 0], sizes = [2, 1], strides = [1, 1]} : vector<2x3xf32> to vector<2x1xf32>
    %cst_12 = arith.constant 5.000000e-01 : f32
    %27 = vector.broadcast %cst_12 : f32 to vector<2x1xf32>
    %28 = arith.mulf %27, %25 : vector<2x1xf32>
    %29 = arith.subf %26, %28 : vector<2x1xf32>
    %30 = vector.extract_strided_slice %5 {offsets = [0, 16], sizes = [2, 16], strides = [1, 1]} : vector<2x51xf32> to vector<2x16xf32>
    %31 = arith.subf %18, %30 : vector<2x16xf32>
    %32 = arith.mulf %31, %19 : vector<2x16xf32>
    %33 = arith.mulf %32, %32 : vector<2x16xf32>
    %cst_13 = arith.constant dense<0.000000e+00> : vector<2xf32>
    %34 = vector.multi_reduction <add>, %33, %cst_13 [1] : vector<2x16xf32> to vector<2xf32>
    %35 = vector.shape_cast %34 : vector<2xf32> to vector<2x1xf32>
    %36 = vector.extract_strided_slice %17 {offsets = [0, 1], sizes = [2, 1], strides = [1, 1]} : vector<2x3xf32> to vector<2x1xf32>
    %cst_14 = arith.constant 5.000000e-01 : f32
    %37 = vector.broadcast %cst_14 : f32 to vector<2x1xf32>
    %38 = arith.mulf %37, %35 : vector<2x1xf32>
    %39 = arith.subf %36, %38 : vector<2x1xf32>
    %40 = vector.extract_strided_slice %5 {offsets = [0, 32], sizes = [2, 16], strides = [1, 1]} : vector<2x51xf32> to vector<2x16xf32>
    %41 = arith.subf %18, %40 : vector<2x16xf32>
    %42 = arith.mulf %41, %19 : vector<2x16xf32>
    %43 = arith.mulf %42, %42 : vector<2x16xf32>
    %cst_15 = arith.constant dense<0.000000e+00> : vector<2xf32>
    %44 = vector.multi_reduction <add>, %43, %cst_15 [1] : vector<2x16xf32> to vector<2xf32>
    %45 = vector.shape_cast %44 : vector<2xf32> to vector<2x1xf32>
    %46 = vector.extract_strided_slice %17 {offsets = [0, 2], sizes = [2, 1], strides = [1, 1]} : vector<2x3xf32> to vector<2x1xf32>
    %cst_16 = arith.constant 5.000000e-01 : f32
    %47 = vector.broadcast %cst_16 : f32 to vector<2x1xf32>
    %48 = arith.mulf %47, %45 : vector<2x1xf32>
    %49 = arith.subf %46, %48 : vector<2x1xf32>
    %50 = arith.maximumf %29, %39 : vector<2x1xf32>
    %51 = arith.maximumf %50, %49 : vector<2x1xf32>
    %cst_17 = arith.constant 0.000000e+00 : f32
    %52 = vector.broadcast %cst_17 : f32 to vector<2x1xf32>
    %53 = arith.subf %29, %51 : vector<2x1xf32>
    %54 = math.exp %53 : vector<2x1xf32>
    %55 = arith.addf %52, %54 : vector<2x1xf32>
    %56 = arith.subf %39, %51 : vector<2x1xf32>
    %57 = math.exp %56 : vector<2x1xf32>
    %58 = arith.addf %55, %57 : vector<2x1xf32>
    %59 = arith.subf %49, %51 : vector<2x1xf32>
    %60 = math.exp %59 : vector<2x1xf32>
    %61 = arith.addf %58, %60 : vector<2x1xf32>
    %62 = math.log %61 : vector<2x1xf32>
    %63 = arith.addf %62, %51 : vector<2x1xf32>
    %cst_18 = arith.constant 0.000000e+00 : f32
    %64 = vector.broadcast %cst_18 : f32 to vector<2x1xf32>
    %65 = arith.subf %64, %63 : vector<2x1xf32>
    %cst_19 = arith.constant dense<0.000000e+00> : vector<1xf32>
    %66 = vector.multi_reduction <add>, %65, %cst_19 [0] : vector<2x1xf32> to vector<1xf32>
    %67 = vector.shape_cast %66 : vector<1xf32> to vector<1x1xf32>
    %cst_20 = arith.constant 2.000000e+00 : f32
    %68 = vector.broadcast %cst_20 : f32 to vector<1x1xf32>
    %69 = arith.divf %67, %68 : vector<1x1xf32>
    %c0_21 = arith.constant 0 : index
    %c0_22 = arith.constant 0 : index
    %70 = vector.load %arg5[%c0_21, %c0_22] : memref<1x1xf32, #tpu.memory_space<vmem>>, vector<1x1xf32>
    tpu.vector_store %arg5[%c0_21, %c0_22], %69 {strides = array<i32>} : memref<1x1xf32, #tpu.memory_space<vmem>>, vector<1x1xf32>,
    return
  }
}

</mosaic_0001>

<bundles_post_ra>
// kernel: multi_regressor_forward.1
= control target key start
LH: loop header
LB: loop body
LE: loop exit
PB: predicated region body
PF: predicated region fallthrough
CT: control target
= control target key end

     0   :  { %v163_v28 = vlaneseq  ;;  %v1147_v36 = vmov 1966171168   ;;  %s1420_s0 = inlined_call_operand.vmem [shape: bf16[2,1024], index: 0, kind: input, shape index: {}]   ;;  %s1421_s1 = inlined_call_operand.vmem [shape: bf16[1024,51], index: 1, kind: input, shape index: {}]   ;;  %s1422_s2 = inlined_call_operand.vmem [shape: f32[1,51], index: 2, kind: input, shape index: {}]   ;;  %s1423_s3 = inlined_call_operand.vmem [shape: f32[2,16], index: 3, kind: input, shape index: {}]   ;;  %s1424_s4 = inlined_call_operand.vmem [shape: f32[2,16], index: 4, kind: input, shape index: {}]   ;;  %s1425_s5 = inlined_call_operand.hbm [shape: f32[1,1], index: 5, kind: output, shape index: {}]  }
   0x1   :  { %v1046_v0 = vld [vmem:[%s1421_s1 + $0x40] sm:$0xff]   ;;  %v1050_v4 = vld [vmem:[%s1421_s1 + $0x48] sm:$0xff]   ;;  %v1054_v8 = vld [vmem:[%s1421_s1 + $0x50] sm:$0xff]   ;;  %v161_v37 = vunpack.c.l.s4 %v1147_v36 }
   0x2   :  { %v1047_v1 = vld [vmem:[%s1421_s1 + $0xc0] sm:$0xff]   ;;  %949 = vmatprep.subr.bf16.mxu0 %v1046_v0  ;;  %v1051_v5 = vld [vmem:[%s1421_s1 + $0xc8] sm:$0xff]   ;;  %v1055_v9 = vld [vmem:[%s1421_s1 + $0xd0] sm:$0xff]   ;;  %v164_v33 = vshrl.u32 %v163_v28, 7 }
   0x3   :  { %v1048_v2 = vld [vmem:[%s1421_s1] sm:$0xff]   ;;  %971 = vmatprep.subr.bf16.mxu1 %v1047_v1  ;;  %v1052_v6 = vld [vmem:[%s1421_s1 + $0x8] sm:$0xff]   ;;  %v1056_v10 = vld [vmem:[%s1421_s1 + $0x10] sm:$0xff]   ;;  %v162_v40 = vunpack.c.0.s8 %v161_v37 }
   0x4   :  { %v1049_v3 = vld [vmem:[%s1421_s1 + $0x80] sm:$0xff]   ;;  %950 = vmatpush3.bf16.msra.mxu0 %v1048_v2  ;;  %v1053_v7 = vld [vmem:[%s1421_s1 + $0x88] sm:$0xff]   ;;  %v1057_v11 = vld [vmem:[%s1421_s1 + $0x90] sm:$0xff]  }
   0x5   :  { %972 = vmatpush3.bf16.msra.mxu1 %v1049_v3  ;;  %951 = vmatprep.subr.bf16.mxu0 %v1050_v4  ;;  %v1058_v12 = vld [vmem:[%s1421_s1 + $0x58] sm:$0xff]   ;;  %v1062_v16 = vld [vmem:[%s1421_s1 + $0x60] sm:$0xff]   ;;  %v1066_v20 = vld [vmem:[%s1421_s1 + $0x68] sm:$0xff]   ;;  %v1291_v41 = vsub.s32 %v162_v40, %v164_v33 }
   0x6   :  { %973 = vmatprep.subr.bf16.mxu1 %v1051_v5  ;;  %v1059_v13 = vld [vmem:[%s1421_s1 + $0xd8] sm:$0xff]   ;;  %v1063_v17 = vld [vmem:[%s1421_s1 + $0xe0] sm:$0xff]   ;;  %v1067_v21 = vld [vmem:[%s1421_s1 + $0xe8] sm:$0xff]  }
   0x7   :  { %v1060_v14 = vld [vmem:[%s1421_s1 + $0x18] sm:$0xff]   ;;  %v1064_v18 = vld [vmem:[%s1421_s1 + $0x20] sm:$0xff]   ;;  %v1068_v22 = vld [vmem:[%s1421_s1 + $0x28] sm:$0xff]  }
   0x8   :  { %952 = vmatpush3.bf16.msra.mxu0 %v1052_v6  ;;  %v1061_v15 = vld [vmem:[%s1421_s1 + $0x98] sm:$0xff]   ;;  %v1065_v19 = vld [vmem:[%s1421_s1 + $0xa0] sm:$0xff]   ;;  %v1069_v23 = vld [vmem:[%s1421_s1 + $0xa8] sm:$0xff]  }
   0x9   :  { %974 = vmatpush3.bf16.msra.mxu1 %v1053_v7  ;;  %953 = vmatprep.subr.bf16.mxu0 %v1054_v8  ;;  %v1070_v24 = vld [vmem:[%s1421_s1 + $0x70] sm:$0xff]   ;;  %v1074_v29 = vld [vmem:[%s1421_s1 + $0x78] sm:$0xff]   ;;  %v22_v34 = vld [vmem:[%s1420_s0] sm:$0xff] }
   0xa   :  { %975 = vmatprep.subr.bf16.mxu1 %v1055_v9  ;;  %v1071_v25 = vld [vmem:[%s1421_s1 + $0xf0] sm:$0xff]   ;;  %v1075_v30 = vld [vmem:[%s1421_s1 + $0xf8] sm:$0xff]   ;;  %v1079_v35 = vld [vmem:[%s1421_s1 + $0x140] sm:$0xff]   ;;  %v159_v39 = vcombine.high %v22_v34, %v22_v34  ;;  %v166_v42 = vrot.slane %v22_v34, %v1291_v41 }
   0xb   :  { %v1072_v26 = vld [vmem:[%s1421_s1 + $0x30] sm:$0xff]   ;;  %v1076_v31 = vld [vmem:[%s1421_s1 + $0x38] sm:$0xff]   ;;  %v1080_v38 = vld [vmem:[%s1421_s1 + $0x1c0] sm:$0xff]  }
   0xc   :  { %954 = vmatpush3.bf16.msra.mxu0 %v1056_v10  ;;  %v1073_v27 = vld [vmem:[%s1421_s1 + $0xb0] sm:$0xff]   ;;  %v1077_v32 = vld [vmem:[%s1421_s1 + $0xb8] sm:$0xff]   ;;  %v1295_v43 = vrot.slane %v159_v39, %v1291_v41  ;;  %v174_v44 = vcombine.high %v166_v42, %v166_v42  ;;  %v182_v45 = vrot.slane %v166_v42, %v1291_v41  ;;  %v1081_v48 = vld [vmem:[%s1421_s1 + $0x100] sm:$0xff]  }
   0xd   :  { %976 = vmatpush3.bf16.msra.mxu1 %v1057_v11  ;;  %955 = vmatprep.subr.bf16.mxu0 %v1058_v12  ;;  %v1083_v51 = vld [vmem:[%s1421_s1 + $0x148] sm:$0xff]   ;;  %v1082_v53 = vld [vmem:[%s1421_s1 + $0x180] sm:$0xff]   ;;  %v1087_v57 = vld [vmem:[%s1421_s1 + $0x150] sm:$0xff]  }
   0xe   :  { %977 = vmatprep.subr.bf16.mxu1 %v1059_v13  ;;  %v175_v46 = vcombine.high %v1295_v43, %v1295_v43  ;;  %v196_v47 = vrot.slane %v174_v44, %v1291_v41  ;;  %v204_v50 = vcombine.high %v182_v45, %v182_v45  ;;  %v1084_v54 = vld [vmem:[%s1421_s1 + $0x1c8] sm:$0xff]   ;;  %v1088_v59 = vld [vmem:[%s1421_s1 + $0x1d0] sm:$0xff]   ;;  %v1091_v61 = vld [vmem:[%s1421_s1 + $0x158] sm:$0xff]  }
   0xf   :  { %v1085_v56 = vld [vmem:[%s1421_s1 + $0x108] sm:$0xff]   ;;  %v1089_v60 = vld [vmem:[%s1421_s1 + $0x110] sm:$0xff]   ;;  %v1092_v63 = vld [vmem:[%s1421_s1 + $0x1d8] sm:$0xff]  }
  0x10   :  { %956 = vmatpush3.bf16.msra.mxu0 %v1060_v14  ;;  %v203_v49 = vrot.slane %v175_v46, %v1291_v41  ;;  %632 = vmatprep.mubr.bf16.mxu0 %v196_v47  ;;  %v206_v52 = vcombine.high %v196_v47, %v196_v47  ;;  %v1086_v58 = vld [vmem:[%s1421_s1 + $0x188] sm:$0xff]   ;;  %v1090_v62 = vld [vmem:[%s1421_s1 + $0x190] sm:$0xff]   ;;  %v1093_v0 = vld [vmem:[%s1421_s1 + $0x118] sm:$0xff]  }
  0x11   :  { %978 = vmatpush3.bf16.msra.mxu1 %v1061_v15  ;;  %957 = vmatprep.subr.bf16.mxu0 %v1062_v16  ;;  %v1095_v1 = vld [vmem:[%s1421_s1 + $0x160] sm:$0xff]   ;;  %v1094_v2 = vld [vmem:[%s1421_s1 + $0x198] sm:$0xff]   ;;  %v1099_v5 = vld [vmem:[%s1421_s1 + $0x168] sm:$0xff]  }
  0x12   :  { %979 = vmatprep.subr.bf16.mxu1 %v1063_v17  ;;  %v207_v55 = vcombine.high %v203_v49, %v203_v49  ;;  %672 = vmatprep.mubr.bf16.mxu1 %v206_v52  ;;  %v1096_v3 = vld [vmem:[%s1421_s1 + $0x1e0] sm:$0xff]   ;;  %v1100_v7 = vld [vmem:[%s1421_s1 + $0x1e8] sm:$0xff]   ;;  %v1103_v9 = vld [vmem:[%s1421_s1 + $0x170] sm:$0xff]  }
  0x13   :  { %v1097_v4 = vld [vmem:[%s1421_s1 + $0x120] sm:$0xff]   ;;  %v1101_v8 = vld [vmem:[%s1421_s1 + $0x128] sm:$0xff]  }
  0x14   :  { %958 = vmatpush3.bf16.msra.mxu0 %v1064_v18  ;;  %v1098_v6 = vld [vmem:[%s1421_s1 + $0x1a0] sm:$0xff]  }
  0x15   :  { %980 = vmatpush3.bf16.msra.mxu1 %v1065_v19  ;;  %959 = vmatprep.subr.bf16.mxu0 %v1066_v20 }
  0x16   :  { %981 = vmatprep.subr.bf16.mxu1 %v1067_v21 }
  0x18   :  { %960 = vmatpush3.bf16.msra.mxu0 %v1068_v22 }
  0x19   :  { %982 = vmatpush3.bf16.msra.mxu1 %v1069_v23  ;;  %961 = vmatprep.subr.bf16.mxu0 %v1070_v24 }
  0x1a   :  { %983 = vmatprep.subr.bf16.mxu1 %v1071_v25 }
  0x1c   :  { %962 = vmatpush3.bf16.msra.mxu0 %v1072_v26 }
  0x1d   :  { %984 = vmatpush3.bf16.msra.mxu1 %v1073_v27  ;;  %963 = vmatprep.subr.bf16.mxu0 %v1074_v29 }
  0x1e   :  { %985 = vmatprep.subr.bf16.mxu1 %v1075_v30 }
  0x20   :  { %964 = vmatpush3.bf16.msra.mxu0 %v1076_v31 }
  0x21   :  { %986 = vmatpush3.bf16.msra.mxu1 %v1077_v32  ;;  %993 = vmatprep.subr.bf16.mxu0 %v1079_v35 }
  0x22   :  { %1015 = vmatprep.subr.bf16.mxu1 %v1080_v38 }
  0x23   :  { %633 = vmatmul.mubr.bf16.vlgmr.msra.gmra.mrb[0].mxu0 %v182_v45 }
  0x24   :  { %994 = vmatpush3.bf16.msra.mxu0 %v1081_v48  ;;  %673 = vmatmul.mubr.bf16.vlgmr.msra.gmra.mrb[0].mxu1 %v204_v50 }
  0x25   :  { %995 = vmatprep.subr.bf16.mxu0 %v1083_v51  ;;  %1016 = vmatpush3.bf16.msra.mxu1 %v1082_v53 }
  0x26   :  { %712 = vmatprep.mubr.bf16.mxu0 %v203_v49  ;;  %1017 = vmatprep.subr.bf16.mxu1 %v1084_v54 }
  0x27   :  { %752 = vmatprep.mubr.bf16.mxu1 %v207_v55 }
  0x28   :  { %996 = vmatpush3.bf16.msra.mxu0 %v1085_v56 }
  0x29   :  { %997 = vmatprep.subr.bf16.mxu0 %v1087_v57  ;;  %1018 = vmatpush3.bf16.msra.mxu1 %v1086_v58 }
  0x2a   :  { %1019 = vmatprep.subr.bf16.mxu1 %v1088_v59 }
  0x2c   :  { %998 = vmatpush3.bf16.msra.mxu0 %v1089_v60 }
  0x2d   :  { %999 = vmatprep.subr.bf16.mxu0 %v1091_v61  ;;  %1020 = vmatpush3.bf16.msra.mxu1 %v1090_v62 }
  0x2e   :  { %1021 = vmatprep.subr.bf16.mxu1 %v1092_v63 }
  0x30   :  { %1000 = vmatpush3.bf16.msra.mxu0 %v1093_v0 }
  0x31   :  { %1001 = vmatprep.subr.bf16.mxu0 %v1095_v1  ;;  %1022 = vmatpush3.bf16.msra.mxu1 %v1094_v2 }
  0x32   :  { %1023 = vmatprep.subr.bf16.mxu1 %v1096_v3 }
  0x34   :  { %1002 = vmatpush3.bf16.msra.mxu0 %v1097_v4 }
  0x35   :  { %1003 = vmatprep.subr.bf16.mxu0 %v1099_v5 }
  0x36   :  { %10 = vsyncpa [#allocation3], 0  ;;  %1024 = vmatpush3.bf16.msra.mxu1 %v1098_v6  ;;  %v1102_v10 = vld [vmem:[%s1421_s1 + $0x1a8] sm:$0xff]   ;;  %v1104_v11 = vld [vmem:[%s1421_s1 + $0x1f0] sm:$0xff]   ;;  %v189_v17 = vrot.slane %v1295_v43, %v1291_v41  ;;  %vm760_vm0 = vcmask 411008   ;;  %s1150_s22 = smov 80  }
  0x37   :  { %1025 = vmatprep.subr.bf16.mxu1 %v1100_v7  ;;  %v1105_v12 = vld [vmem:[%s1421_s1 + $0x130] sm:$0xff]   ;;  %v1107_v13 = vld [vmem:[%s1421_s1 + $0x178] sm:$0xff]   ;;  %v884_v21 = vld [vmem:[%s1422_s2] ss:$0 sm:$0xff]  ;;  %s1149_s2 = smov 96   ;;  %vm784_vm1 = vcmask 123904  }
  0x38   :  { %1004 = vmatpush3.bf16.msra.mxu0 %v1101_v8  ;;  %v1106_v14 = vld [vmem:[%s1421_s1 + $0x1b0] sm:$0xff]   ;;  %v1108_v15 = vld [vmem:[%s1421_s1 + $0x1f8] sm:$0xff]   ;;  %v205_v19 = vcombine.high %v189_v17, %v189_v17  ;;  %v779_v51 = vld [vmem:[%s1423_s3] sm:$0x3]  ;;  %vm771_vm2 = vcmask 17408   ;;  %s1151_s3 = smov 126  }
  0x39   :  { %1005 = vmatprep.subr.bf16.mxu0 %v1103_v9  ;;  %v1109_v16 = vld [vmem:[%s1421_s1 + $0x138] sm:$0xff]   ;;  %v780_v53 = vld [vmem:[%s1424_s4] sm:$0x3]  ;;  %s1152_s4 = smov 127   ;;  %s1153_s27 = smov 1   ;;  %vm854_vm3 = vcmask 394624  }
  0x3a   :  { %1026 = vmatpush3.bf16.msra.mxu1 %v1102_v10  ;;  %v1110_v18 = vld [vmem:[%s1421_s1 + $0x1b8] sm:$0xff]   ;;  %s1148_s1 = smov 112   ;;  %s1154_s28 = smov 2   ;;  %vm868_vm4 = vcmask 0  }
  0x3b   :  { %1027 = vmatprep.subr.bf16.mxu1 %v1104_v11  ;;  %s1155_s29 = smov [#allocation2]  }
  0x3c   :  { %1006 = vmatpush3.bf16.msra.mxu0 %v1105_v12  ;;  %s876_s30 = sshll.u32 %s1155_s29, 4  ;;  %s877_s30 = int_to_ptr.vmem [resolvable:$true] %s876_s30 }
  0x3d   :  { %1007 = vmatprep.subr.bf16.mxu0 %v1107_v13  ;;  %s1123_s6 = scalar_lea.vmem %s877_s30, 16  ;;  %s1127_s7 = scalar_lea.vmem %s877_s30, 32 }
  0x3e   :  { %1028 = vmatpush3.bf16.msra.mxu1 %v1106_v14  ;;  %p1124_p0 = scmp.ne.s32.totalorder %s877_s30, %s1123_s6  ;;  %p1128_p1 = scmp.lt.s32.totalorder %s877_s30, %s877_s30 }
  0x3f   :  { %1029 = vmatprep.subr.bf16.mxu1 %v1108_v15  ;;  %p1129_p2 = scmp.lt.s32.totalorder %s1127_s7, %s1123_s6 }
  0x40   :  { %1008 = vmatpush3.bf16.msra.mxu0 %v1109_v16 }
  0x41   :  { %p1130_p3 = por %p1129_p2, %p1128_p1 }
  0x42   :  { %1030 = vmatpush3.bf16.msra.mxu1 %v1110_v18 }
  0x43   :  { %713 = vmatmul.mubr.bf16.vlgmr.msra.gmra.mrb[4].mxu0 %v189_v17  ;;  %p1131_p4 = pnand %p1130_p3, %p1124_p0 }
  0x45   :  { %753 = vmatmul.mubr.bf16.vlgmr.msra.gmra.mrb[4].mxu1 %v205_v19 }
  0xf6   :  { %v965_v20 = vpop.f32.mrb[0].mxu0 }
  0xf7   :  { %v966_v22 = vpop.f32.mrb[1].mxu0  ;;  %v987_v23 = vpop.f32.mrb[0].mxu1 }
  0xf8   :  { %v967_v24 = vadd.f32 %v966_v22, %v965_v20  ;;  %v968_v25 = vpop.f32.mrb[2].mxu0  ;;  %v988_v26 = vpop.f32.mrb[1].mxu1 }
  0xf9   :  { %v969_v27 = vpop.f32.mrb[3].mxu0  ;;  %v989_v29 = vadd.f32 %v988_v26, %v987_v23  ;;  %v990_v30 = vpop.f32.mrb[2].mxu1 }
  0xfa   :  { %v635_v28 = vadd.f32 %v967_v24, %v884_v21  ;;  %v991_v31 = vpop.f32.mrb[3].mxu1 }
  0xfc   :  { %v675_v32 = vadd.f32 %v989_v29, %v635_v28 }
 0x116   :  { %v1009_v33 = vpop.f32.mrb[4].mxu0 }
 0x117   :  { %v1010_v34 = vpop.f32.mrb[5].mxu0 }
 0x118   :  { %v1031_v35 = vpop.f32.mrb[4].mxu1  ;;  %v1011_v36 = vadd.f32 %v1010_v34, %v1009_v33  ;;  %v1012_v37 = vpop.f32.mrb[6].mxu0 }
 0x119   :  { %v1032_v38 = vpop.f32.mrb[5].mxu1  ;;  %v1013_v39 = vpop.f32.mrb[7].mxu0 }
 0x11a   :  { %v715_v40 = vadd.f32 %v1011_v36, %v675_v32  ;;  %v1033_v41 = vadd.f32 %v1032_v38, %v1031_v35  ;;  %v1034_v42 = vpop.f32.mrb[6].mxu1 }
 0x11b   :  { %v1035_v43 = vpop.f32.mrb[7].mxu1 }
 0x11c   :  { %v755_v44 = vadd.f32 %v1033_v41, %v715_v40 }
 0x11e   :  { %791 = vrot.lane.b32.xlu1 %v755_v44, %s1148_s1  ;;  %v761_v45 = vsel %vm760_vm0, %v755_v44, -inf  ;;  %v781_v60 = vsub.f32 %v779_v51, %v755_v44 }
 0x11f   :  { %762 = vmax.xlane.f32.xlu0 %v761_v45 }
 0x120   :  { %v782_v0 = vmul.f32 %v781_v60, %v780_v53 }
 0x122   :  { %802 = vrot.lane.b32.xlu1 %v755_v44, %s1149_s2  ;;  %v783_v2 = vmul.f32 %v782_v0, %v782_v0 }
 0x124   :  { %v785_v3 = vsel %vm784_vm1, %v783_v2, 0.0 }
 0x190   :  { %v792_v50 = vpop.permute.xlu1 %791 }
 0x191   :  { %v794_v52 = vsub.f32 %v779_v51, %v792_v50 }
 0x193   :  { %v795_v54 = vmul.f32 %v794_v52, %v780_v53 }
 0x194   :  { %v803_v57 = vpop.permute.xlu1 %802 }
 0x195   :  { %v796_v55 = vmul.f32 %v795_v54, %v795_v54  ;;  %v805_v58 = vsub.f32 %v779_v51, %v803_v57 }
 0x197   :  { %v797_v56 = vsel %vm784_vm1, %v796_v55, 0.0  ;;  %v806_v59 = vmul.f32 %v805_v58, %v780_v53 }
 0x199   :  { %v807_v63 = vmul.f32 %v806_v59, %v806_v59 }
 0x19b   :  { %v808_v1 = vsel %vm784_vm1, %v807_v63, 0.0 }
 0x1ac   :  { %v763_v46 = vpop.xlane.xlu0 %762 }
 0x1ad   :  { %v764_v47 = vsub.f32 %v755_v44, %v763_v46 }
 0x1af   :  { %v765_v48 = vmul.f32 1.442695, %v764_v47 }
 0x1b1   :  { %1111 = vpow2.f32 %v765_v48 }
 0x1bb   :  { %v1112_v49 = vpop.eup %1111 }
 0x1bc   :  { %768 = vrot.lane.b32.xlu0 %v1112_v49, %s1150_s22 }
 0x1db   :  { %798 = vadd.xlane.f32.xlu0 %v797_v56 }
 0x22e   :  { %v769_v61 = vpop.permute.xlu0 %768 }
 0x22f   :  { %v772_v62 = vsel %vm771_vm2, %v769_v61, 0.0 }
 0x230   :  { %773 = vadd.xlane.f32.xlu1 %v772_v62 }
 0x234   :  { %809 = vadd.xlane.f32.xlu1 %v808_v1 }
 0x238   :  { %786 = vadd.xlane.f32.xlu1 %v785_v3 }
 0x268   :  { %v799_v7 = vpop.xlane.xlu0 %798 }
 0x269   :  { %v800_v10 = vmul.f32 0.5, %v799_v7 }
 0x2bd   :  { %v774_v4 = vpop.xlane.xlu1 %773 }
 0x2be   :  { %1113 = vlog2.f32 %v774_v4 }
 0x2c1   :  { %v810_v8 = vpop.xlane.xlu1 %809 }
 0x2c2   :  { %v811_v12 = vmul.f32 0.5, %v810_v8 }
 0x2c5   :  { %v787_v15 = vpop.xlane.xlu1 %786 }
 0x2c6   :  { %v788_v16 = vmul.f32 0.5, %v787_v15 }
 0x2c8   :  { %v1114_v5 = vpop.eup %1113 }
 0x2c9   :  { %v776_v6 = vmul.f32 0.6931472, %v1114_v5 }
 0x2cb   :  { %v777_v9 = vadd.f32 %v776_v6, %v763_v46 }
 0x2cd   :  { %v778_v11 = vsub.f32 %v755_v44, %v777_v9 }
 0x2cf   :  { %v812_v13 = vsub.f32 %v778_v11, %v811_v12  ;;  %v801_v14 = vsub.f32 %v778_v11, %v800_v10  ;;  %v789_v17 = vsub.f32 %v778_v11, %v788_v16 }
 0x2d1   :  { %819 = vrot.lane.b32.xlu0 %v812_v13, %s1151_s3  ;;  %814 = vrot.lane.b32.xlu1 %v801_v14, %s1152_s4 }
 0x343   :  { %v815_v18 = vpop.permute.xlu1 %814  ;;  %v820_v20 = vpop.permute.xlu0 %819 }
 0x344   :  { %v817_v19 = vmax.f32 %v789_v17, %v815_v18 }
 0x346   :  { %v822_v21 = vmax.f32 %v817_v19, %v820_v20 }
 0x348   :  { %828 = vrot.lane.b32.xlu1 %v822_v21, %s1153_s27  ;;  %v823_v30 = vsub.f32 %v789_v17, %v822_v21 }
 0x34a   :  { %v824_v31 = vmul.f32 1.442695, %v823_v30 }
 0x34c   :  { %839 = vrot.lane.b32.xlu1 %v822_v21, %s1154_s28 }
 0x3ba   :  { %v829_v22 = vpop.permute.xlu1 %828 }
 0x3bb   :  { %v831_v23 = vsub.f32 %v801_v14, %v829_v22 }
 0x3bd   :  { %v832_v24 = vmul.f32 1.442695, %v831_v23 }
 0x3be   :  { %v840_v25 = vpop.permute.xlu1 %839 }
 0x3bf   :  { %1115 = vpow2.f32 %v832_v24  ;;  %v842_v26 = vsub.f32 %v812_v13, %v840_v25 }
 0x3c1   :  { %v843_v27 = vmul.f32 1.442695, %v842_v26 }
 0x3c3   :  { %1117 = vpow2.f32 %v843_v27 }
 0x3c4   :  { %1119 = vpow2.f32 %v824_v31 }
 0x3c9   :  { %v1116_v28 = vpop.eup %1115 }
 0x3ca   :  { %835 = vrot.lane.b32.xlu1 %v1116_v28, %s1152_s4 }
 0x3cd   :  { %v1118_v29 = vpop.eup %1117 }
 0x3ce   :  { %846 = vrot.lane.b32.xlu0 %v1118_v29, %s1151_s3  ;;  %v1120_v33 = vpop.eup %1119 }
 0x43c   :  { %v836_v32 = vpop.permute.xlu1 %835 }
 0x43d   :  { %v838_v34 = vadd.f32 %v1120_v33, %v836_v32 }
 0x440   :  { %v847_v35 = vpop.permute.xlu0 %846 }
 0x441   :  { %v849_v36 = vadd.f32 %v847_v35, %v838_v34 }
 0x443   :  { %1121 = vlog2.f32 %v849_v36 }
 0x44d   :  { %v1122_v37 = vpop.eup %1121 }
 0x44e   :  { %v851_v38 = vmul.f32 0.6931472, %v1122_v37 }
 0x450   :  { %v852_v39 = vadd.f32 %v851_v38, %v822_v21 }
 0x452   :  { %v853_v40 = vsub.f32 0.0, %v852_v39 }
 0x454   :  { %v855_v41 = vsel %vm854_vm3, %v853_v40, 0.0 }
 0x455   :  { %v856_v42 = vrot.slane %v855_v41, 4 }
 0x457   :  { %v857_v43 = vadd.f32 %v856_v42, %v855_v41 }
 0x459   :  { %v858_v44 = vrot.slane %v857_v43, 2 }
 0x45b   :  { %v859_v45 = vadd.f32 %v858_v44, %v857_v43 }
 0x45d   :  { %v860_v46 = vrot.slane %v859_v45, 1 }
 0x45f   :  { %v861_v47 = vadd.f32 %v860_v46, %v859_v45 }
 0x461   :  { %v863_v48 = vmul.f32 0.5, %v861_v47 }
 0x463   :  { %865 = vrot.lane.b32.xlu1 %v863_v48, %s1150_s22 }
 0x4d5   :  { %v866_v49 = vpop.permute.xlu1 %865 }
 0x4d6   :  { %869 = vst.msk [vmem:[#allocation2] sm:$0x1] %vm868_vm4, %v866_v49 }
 0x4d7   :  { %1134 = shalt.err (!%p1131_p4)
}
 0x4d8   :  { %s1135_s10 = scalar_lea.hbm %s1425_s5, 16 }
 0x4d9   :  { %p1136_p5 = scmp.ne.s32.totalorder %s1425_s5, %s1135_s10  ;;  %p1139_p6 = scmp.lt.u32.totalorder %s1135_s10, %s1425_s5 }
 0x4db   :  { %p1141_p7 = pnand %p1139_p6, %p1136_p5 }
 0x4dd   :  { %1144 = shalt.err (!%p1141_p7)
}
 0x4de   :  { %879 = dma.vmem_to_hbm [thread:$0]  %s877_s30, 16, %s1425_s5, [#allocation3]  }
 0x4df   :  { %1145 = dma.done.wait [#allocation3], 16  }
 0x4e0   :  { %1146 = vsyncadd [#allocation3], 4294967280 }
 0x4e1   :  { %883 = vsyncpa [#allocation3], 1 }

</bundles_post_ra>
